<compile_context>
chip_gen: v7x
topology: tpu7x:2x2x1
jax: 0.10.0
libtpu: 0.0.40
codegen_flags: <defaults>
</compile_context>

<pallas_src>
import jax
import jax.numpy as jnp
from jax.experimental import pallas as pl
from jax.experimental.pallas import tpu as pltpu


def _lambda_dma_copy_kernel(x_hbm, o_hbm, sem):
    # Single whole-array HBM->HBM DMA: identity copy at HBM roofline.
    cp = pltpu.make_async_copy(x_hbm, o_hbm, sem)
    cp.start()
    cp.wait()


def lambda_preprocess(x, *, use_pallas=True):
    """Pallas implementation of Lambda(preprocess): x.view(-1, 1, 28, 28).

    use_pallas=False is the optimal path (pure metadata reshape, zero HBM
    traffic).  use_pallas=True demonstrates the minimal data-touching Pallas
    path: one HBM->HBM DMA, then the same metadata reshape.
    """
    B, F = x.shape
    assert F == 28 * 28, "preprocess expects flat MNIST rows of length 784"

    if not use_pallas:
        # Optimal 'kernel' is no kernel: reshape is metadata-only in JAX too.
        return x.reshape(B, 1, 28, 28)

    itemsize = jnp.dtype(x.dtype).itemsize
    flat = pl.pallas_call(
        _lambda_dma_copy_kernel,
        out_shape=jax.ShapeDtypeStruct((B, F), x.dtype),
        in_specs=[pl.BlockSpec(memory_space=pl.ANY)],
        out_specs=pl.BlockSpec(memory_space=pl.ANY),
        scratch_shapes=[pltpu.SemaphoreType.DMA(())],
        cost_estimate=pl.CostEstimate(
            flops=0,
            transcendentals=0,
            bytes_accessed=2 * B * F * itemsize,  # read + write
        ),
    )(x)

    # Glue: the actual "view" — pure metadata reshape, same as torch .view().
    # TODO(synk): Lambda is generic over any Python callable; only the
    # tutorial's preprocess instance (a reshape) is realized here.
    return flat.reshape(B, 1, 28, 28)


if __name__ == "__main__":
    key = jax.random.PRNGKey(0)
    B = 16  # small batch; flat MNIST-style rows
    x = jax.random.normal(key, (B, 28 * 28), dtype=jnp.float32)

    out = lambda_preprocess(x)
    out = jax.block_until_ready(out)

    # Correctness vs. the reference semantics of x.view(-1, 1, 28, 28).
    ref = x.reshape(B, 1, 28, 28)
    assert out.shape == (B, 1, 28, 28), out.shape
    assert out.dtype == x.dtype, out.dtype
    assert bool(jnp.allclose(out, ref)), "mismatch vs reference reshape"

    # Also exercise the no-kernel fast path (the truly optimal implementation).
    out_fast = jax.block_until_ready(lambda_preprocess(x, use_pallas=False))
    assert bool(jnp.allclose(out_fast, ref)), "mismatch on reshape-only path"

    # Odd batch size (not a multiple of 8) — the DMA path has no layout
    # constraints, so this just works.
    B2 = 5
    x2 = jax.random.normal(jax.random.PRNGKey(1), (B2, 28 * 28), jnp.float32)
    out2 = jax.block_until_ready(lambda_preprocess(x2))
    assert bool(jnp.allclose(out2, x2.reshape(B2, 1, 28, 28))), "odd-batch mismatch"

    print("KERNEL_OK")
</pallas_src>

<mosaic_0001>
module attributes {stable_mosaic.version = 11 : i64} {
  func.func @_lambda_dma_copy_kernel(%arg0: memref<16x784xf32, #tpu.memory_space<any>>, %arg1: memref<16x784xf32, #tpu.memory_space<any>>, %arg2: memref<!tpu.dma_semaphore, #tpu.memory_space<semaphore_mem>>) attributes {dimension_semantics = [], scalar_prefetch = 0 : i64, scratch_operands = 1 : i64, tpu.core_type = #tpu.core_type<tc>} {
    tpu.enqueue_dma source(%arg0 : memref<16x784xf32, #tpu.memory_space<any>>) target(%arg1 : memref<16x784xf32, #tpu.memory_space<any>>) target_semaphore(%arg2 : memref<!tpu.dma_semaphore, #tpu.memory_space<semaphore_mem>>)
    tpu.wait_dma2 semaphore(%arg2 : memref<!tpu.dma_semaphore, #tpu.memory_space<semaphore_mem>>) src(%arg0 : memref<16x784xf32, #tpu.memory_space<any>>) dst(%arg1 : memref<16x784xf32, #tpu.memory_space<any>>)
    return
  }
}

</mosaic_0001>

<bundles_post_ra>
// kernel: tpu_custom_call.1
= control target key start
LH: loop header
LB: loop body
LE: loop exit
PB: predicated region body
PF: predicated region fallthrough
CT: control target
= control target key end

     0   :  { %s35_s6 = smov [#allocation2]   ;;  %s36_s7 = smov [#allocation3]   ;;  %s54_s0 = inlined_call_operand.hbm [shape: f32[16,784], index: 0, kind: input, shape index: {}]   ;;  %s55_s1 = inlined_call_operand.hbm [shape: f32[16,784], index: 1, kind: output, shape index: {}]  }
   0x1   :  { %s37_s8 = smov 0  }
   0x2   :  { %18 = dma.general %s54_s0, 1792, %s55_s1, %s35_s6, %s36_s7, [#allocation4], %s37_s8, 0  }
   0x3   :  { %33 = dma.done.wait [#allocation2], 1792 }
   0x4   :  { %34 = vsyncadd [#allocation2], 4294965504 }
   0x5   :  { %23 = vsyncmov [#allocation2] }
   0x8   :  { %s24_s13 = vpop.sfrf %23 }
   0x9   :  { %p29_p0 = scmp.ne.s32.totalorder %s24_s13, 0 }
   0xb   :  { %28 = shalt.err (%p29_p0)  }

</bundles_post_ra>
